<compile_context>
chip_gen: v6e
topology: v6e:2x2x1
jax: 0.10.0
libtpu: 0.0.40
codegen_flags: <defaults>
</compile_context>

<pallas_src>
import jax
import jax.numpy as jnp
from jax.experimental import pallas as pl
from jax.experimental.pallas import tpu as pltpu

_LANE = 128
_BF16_ROWS = 16  # bf16 packs 16 rows per vreg (sublane dimension)


def _round_up(x, m):
    return ((x + m - 1) // m) * m


def _pad_axis(x, target, axis):
    pad = target - x.shape[axis]
    if pad <= 0:
        return x
    widths = [(0, 0)] * x.ndim
    widths[axis] = (0, pad)
    return jnp.pad(x, widths)


# --------------------------------------------------------------------------- #
# Kernel                                                                      #
# --------------------------------------------------------------------------- #
def actor_kernel(x_ref, w1_ref, b1_ref, w2_ref, b2_ref, w3_ref, b3_ref, o_ref):
    # One batch tile; all three layers fused, everything VMEM-resident.
    x = x_ref[...]                                                  # (TB, in) bf16

    # fc1 + ReLU  (bf16 matmul, f32 accumulate, f32 elementwise)
    h1 = jnp.dot(x, w1_ref[...], preferred_element_type=jnp.float32) + b1_ref[...]
    h1 = jnp.maximum(h1, 0.0)

    # fc2 + ReLU
    h2 = jnp.dot(h1.astype(jnp.bfloat16), w2_ref[...],
                 preferred_element_type=jnp.float32) + b2_ref[...]
    h2 = jnp.maximum(h2, 0.0)

    # out + tanh  (output padded to 128 lanes -> unmasked stores)
    y = jnp.dot(h2.astype(jnp.bfloat16), w3_ref[...],
                preferred_element_type=jnp.float32) + b3_ref[...]
    o_ref[...] = jnp.tanh(y).astype(o_ref.dtype)


# --------------------------------------------------------------------------- #
# Parameter preparation (done ONCE, outside the per-call wrapper)             #
# --------------------------------------------------------------------------- #
def prepare_actor_params(w1, b1, w2, b2, w3, b3):
    """Cast weights to bf16, biases to f32 (1, dim) rows, pad final layer to a
    lane-dense (multiple-of-128) width.  Do this once at init, not per call."""
    n_actions = w3.shape[1]
    n_pad = _round_up(max(n_actions, 1), _LANE)
    return {
        "w1": w1.astype(jnp.bfloat16),
        "b1": b1.reshape(1, -1).astype(jnp.float32),
        "w2": w2.astype(jnp.bfloat16),
        "b2": b2.reshape(1, -1).astype(jnp.float32),
        "w3": _pad_axis(w3, n_pad, axis=1).astype(jnp.bfloat16),
        "b3": _pad_axis(b3.reshape(1, -1).astype(jnp.float32), n_pad, axis=1),
    }


# --------------------------------------------------------------------------- #
# Batch-tile selection                                                        #
# --------------------------------------------------------------------------- #
def _choose_batch_tile(B, block_b):
    """Pick TB (multiple of 16 for bf16 row packing) aiming at:
       * large tiles (amortize ~0.35 us/step grid overhead),
       * >=2 grid steps when the batch allows (dual-TC sharding on v7x),
       * a tile dividing the batch when that doesn't shrink it much
         (avoids a wrapper-side jnp.pad copy of `state`)."""
    B16 = _round_up(max(B, 1), _BF16_ROWS)
    if B16 <= _BF16_ROWS:
        return B16  # tiny batch: single tile
    limit = min(_round_up(block_b, _BF16_ROWS), _round_up(B16 // 2, _BF16_ROWS))
    limit = max(limit, _BF16_ROWS)
    # Largest multiple of 16 <= limit that divides the (16-rounded) batch.
    best = _BF16_ROWS
    for tb in range(limit, _BF16_ROWS - 1, -_BF16_ROWS):
        if B16 % tb == 0:
            best = tb
            break
    if best * 2 >= limit:
        return best
    # Otherwise go big (multiple of 256 for MXU M-granularity when possible).
    if limit >= 256:
        return (limit // 256) * 256
    return limit


# --------------------------------------------------------------------------- #
# Forward wrapper                                                             #
# --------------------------------------------------------------------------- #
def actor_forward(state, params, n_actions, *, block_b=1024,
                  out_dtype=jnp.float32):
    """state: (B, input_dim) f32/bf16.  params: from prepare_actor_params.
    Returns (B, n_actions) in out_dtype (f32 default; bf16 halves writeback)."""
    w1, b1 = params["w1"], params["b1"]
    w2, b2 = params["w2"], params["b2"]
    w3, b3 = params["w3"], params["b3"]

    B, input_dim = state.shape
    fc1_dim = w1.shape[1]
    fc2_dim = w2.shape[1]
    n_pad = w3.shape[1]

    TB = _choose_batch_tile(B, block_b)
    B_pad = _round_up(B, TB)
    grid = (B_pad // TB,)

    # State enters the MXU as bf16; cast once here (no-op if already bf16) and
    # only pad the batch if TB doesn't divide it (tile chooser avoids this
    # whenever it can).
    x_p = _pad_axis(state.astype(jnp.bfloat16), B_pad, axis=0)

    const = lambda shape: pl.BlockSpec(shape, lambda i: (0, 0))  # VMEM-resident

    out_itemsize = jnp.dtype(out_dtype).itemsize
    flops = 2 * B_pad * (input_dim * fc1_dim + fc1_dim * fc2_dim + fc2_dim * n_pad)
    bytes_accessed = (x_p.size * 2 + (w1.size + w2.size + w3.size) * 2
                      + (b1.size + b2.size + b3.size) * 4
                      + B_pad * n_pad * out_itemsize)

    # Explicit VMEM budget: double-buffered I/O tiles + resident weights/biases
    # + f32 activation temporaries, with 2x headroom (loud failure if scaled up
    # past v7x's 64 MiB instead of a silent spill).
    vmem_need = (2 * TB * input_dim * 2                      # input tiles (bf16)
                 + 2 * TB * n_pad * out_itemsize             # output tiles
                 + 2 * (w1.size + w2.size + w3.size) * 2     # weights (bf16)
                 + 2 * (b1.size + b2.size + b3.size) * 4     # biases (f32)
                 + 2 * TB * (fc1_dim + fc2_dim + n_pad) * 4) # h1/h2/y temps
    vmem_limit = int(min(max(32 << 20, 2 * vmem_need), 64 << 20))

    out_padded = pl.pallas_call(
        actor_kernel,
        out_shape=jax.ShapeDtypeStruct((B_pad, n_pad), out_dtype),
        grid=grid,
        in_specs=[
            pl.BlockSpec((TB, input_dim), lambda i: (i, 0)),   # state: batch-tiled
            const(w1.shape), const(b1.shape),                  # weights/biases resident
            const(w2.shape), const(b2.shape),
            const(w3.shape), const(b3.shape),
        ],
        out_specs=pl.BlockSpec((TB, n_pad), lambda i: (i, 0)),  # lane-dense output slab
        compiler_params=pltpu.CompilerParams(
            dimension_semantics=("parallel",),                  # dual-TC on v7x
            vmem_limit_bytes=vmem_limit),
        cost_estimate=pl.CostEstimate(
            flops=flops,
            transcendentals=B_pad * n_pad,
            bytes_accessed=bytes_accessed),
    )(x_p, w1, b1, w2, b2, w3, b3)

    return out_padded[:B, :n_actions]


# --------------------------------------------------------------------------- #
# References & init                                                           #
# --------------------------------------------------------------------------- #
def actor_reference_f32(state, w1, b1, w2, b2, w3, b3):
    """Pure-JAX f32 reference of the PyTorch forward."""
    h1 = jax.nn.relu(state @ w1 + b1)
    h2 = jax.nn.relu(h1 @ w2 + b2)
    return jnp.tanh(h2 @ w3 + b3)


def actor_reference_mixed(state, w1, b1, w2, b2, w3, b3):
    """Reference mirroring the kernel's bf16-input/bf16-weight, f32-accumulate math."""
    bf = jnp.bfloat16
    h1 = jnp.maximum(jnp.dot(state.astype(bf), w1.astype(bf),
                             preferred_element_type=jnp.float32) + b1, 0.0)
    h2 = jnp.maximum(jnp.dot(h1.astype(bf), w2.astype(bf),
                             preferred_element_type=jnp.float32) + b2, 0.0)
    return jnp.tanh(jnp.dot(h2.astype(bf), w3.astype(bf),
                            preferred_element_type=jnp.float32) + b3)


def init_linear(key, fan_in, fan_out):
    """Deterministic init mimicking torch.nn.Linear (uniform +/- 1/sqrt(fan_in)).
    Returned weight is (fan_in, fan_out), i.e. transposed vs. PyTorch storage."""
    kw, kb = jax.random.split(key)
    bound = 1.0 / jnp.sqrt(fan_in)
    w = jax.random.uniform(kw, (fan_in, fan_out), jnp.float32, -bound, bound)
    b = jax.random.uniform(kb, (fan_out,), jnp.float32, -bound, bound)
    return w, b


if __name__ == "__main__":
    # Small, MXU/VPU-friendly shapes consistent with a TD3 actor.
    batch = 8
    input_dim = 32
    fc1_dim = 128
    fc2_dim = 128
    n_actions = 8

    key = jax.random.PRNGKey(0)
    k_state, k1, k2, k3 = jax.random.split(key, 4)

    state = jax.random.normal(k_state, (batch, input_dim), jnp.float32)
    w1, b1 = init_linear(k1, input_dim, fc1_dim)
    w2, b2 = init_linear(k2, fc1_dim, fc2_dim)
    w3, b3 = init_linear(k3, fc2_dim, n_actions)

    # One-time param prep (bf16 weights, lane-padded final layer).
    params = prepare_actor_params(w1, b1, w2, b2, w3, b3)

    out = actor_forward(state, params, n_actions)
    out = jax.block_until_ready(out)
    assert out.shape == (batch, n_actions)

    # Tight check vs. a reference using the same bf16-input/bf16-weight math.
    ref_mixed = actor_reference_mixed(state, w1, b1, w2, b2, w3, b3)
    assert jnp.allclose(out, ref_mixed, atol=1e-4, rtol=1e-4), "mismatch vs mixed ref"

    # Loose sanity check vs. the pure-f32 PyTorch-equivalent forward.
    # (bf16 weights/activations are an explicit precision choice here.)
    ref_f32 = actor_reference_f32(state, w1, b1, w2, b2, w3, b3)
    assert jnp.allclose(out, ref_f32, atol=3e-2, rtol=3e-2), "mismatch vs f32 ref"

    print("KERNEL_OK")
</pallas_src>

<mosaic_0001>
module attributes {stable_mosaic.version = 11 : i64} {
  func.func @actor_kernel(%arg0: i32, %arg1: memref<16x32xbf16, #tpu.memory_space<vmem>>, %arg2: memref<32x128xbf16, #tpu.memory_space<vmem>>, %arg3: memref<1x128xf32, #tpu.memory_space<vmem>>, %arg4: memref<128x128xbf16, #tpu.memory_space<vmem>>, %arg5: memref<1x128xf32, #tpu.memory_space<vmem>>, %arg6: memref<128x128xbf16, #tpu.memory_space<vmem>>, %arg7: memref<1x128xf32, #tpu.memory_space<vmem>>, %arg8: memref<16x128xf32, #tpu.memory_space<vmem>>) attributes {dimension_semantics = [#tpu.dimension_semantics<parallel>], iteration_bounds = array<i64: 1>, scalar_prefetch = 0 : i64, scratch_operands = 0 : i64, tpu.core_type = #tpu.core_type<tc>, window_params = [{transform_indices = @transform_0, window_bounds = array<i64: 16, 32>}, {pipeline_mode = #tpu.pipeline_mode<synchronous>, transform_indices = @transform_1, window_bounds = array<i64: 32, 128>}, {pipeline_mode = #tpu.pipeline_mode<synchronous>, transform_indices = @transform_2, window_bounds = array<i64: 1, 128>}, {pipeline_mode = #tpu.pipeline_mode<synchronous>, transform_indices = @transform_3, window_bounds = array<i64: 128, 128>}, {pipeline_mode = #tpu.pipeline_mode<synchronous>, transform_indices = @transform_4, window_bounds = array<i64: 1, 128>}, {pipeline_mode = #tpu.pipeline_mode<synchronous>, transform_indices = @transform_5, window_bounds = array<i64: 128, 128>}, {pipeline_mode = #tpu.pipeline_mode<synchronous>, transform_indices = @transform_6, window_bounds = array<i64: 1, 128>}, {transform_indices = @transform_7, window_bounds = array<i64: 16, 128>}]} {
    %c0 = arith.constant 0 : index
    %c0_0 = arith.constant 0 : index
    %0 = vector.load %arg1[%c0, %c0_0] : memref<16x32xbf16, #tpu.memory_space<vmem>>, vector<16x32xbf16>
    %c0_1 = arith.constant 0 : index
    %c0_2 = arith.constant 0 : index
    %1 = vector.load %arg2[%c0_1, %c0_2] : memref<32x128xbf16, #tpu.memory_space<vmem>>, vector<32x128xbf16>
    %cst = arith.constant dense<0.000000e+00> : vector<16x128xf32>
    %2 = tpu.matmul %0, %1, %cst {dimension_numbers = #tpu.dot_dimension_numbers<[1], [0], [0], [1], [0, 0, 1, 1], [], []>} : vector<16x32xbf16>, vector<32x128xbf16>, vector<16x128xf32> -> vector<16x128xf32>
    %c0_3 = arith.constant 0 : index
    %c0_4 = arith.constant 0 : index
    %3 = vector.load %arg3[%c0_3, %c0_4] : memref<1x128xf32, #tpu.memory_space<vmem>>, vector<1x128xf32>
    %4 = vector.broadcast %3 : vector<1x128xf32> to vector<16x128xf32>
    %5 = arith.addf %2, %4 : vector<16x128xf32>
    %cst_5 = arith.constant 0.000000e+00 : f32
    %6 = vector.broadcast %cst_5 : f32 to vector<16x128xf32>
    %7 = arith.maximumf %5, %6 : vector<16x128xf32>
    %8 = arith.truncf %7 : vector<16x128xf32> to vector<16x128xbf16>
    %c0_6 = arith.constant 0 : index
    %c0_7 = arith.constant 0 : index
    %9 = vector.load %arg4[%c0_6, %c0_7] : memref<128x128xbf16, #tpu.memory_space<vmem>>, vector<128x128xbf16>
    %cst_8 = arith.constant dense<0.000000e+00> : vector<16x128xf32>
    %10 = tpu.matmul %8, %9, %cst_8 {dimension_numbers = #tpu.dot_dimension_numbers<[1], [0], [0], [1], [0, 0, 1, 1], [], []>} : vector<16x128xbf16>, vector<128x128xbf16>, vector<16x128xf32> -> vector<16x128xf32>
    %c0_9 = arith.constant 0 : index
    %c0_10 = arith.constant 0 : index
    %11 = vector.load %arg5[%c0_9, %c0_10] : memref<1x128xf32, #tpu.memory_space<vmem>>, vector<1x128xf32>
    %12 = vector.broadcast %11 : vector<1x128xf32> to vector<16x128xf32>
    %13 = arith.addf %10, %12 : vector<16x128xf32>
    %cst_11 = arith.constant 0.000000e+00 : f32
    %14 = vector.broadcast %cst_11 : f32 to vector<16x128xf32>
    %15 = arith.maximumf %13, %14 : vector<16x128xf32>
    %16 = arith.truncf %15 : vector<16x128xf32> to vector<16x128xbf16>
    %c0_12 = arith.constant 0 : index
    %c0_13 = arith.constant 0 : index
    %17 = vector.load %arg6[%c0_12, %c0_13] : memref<128x128xbf16, #tpu.memory_space<vmem>>, vector<128x128xbf16>
    %cst_14 = arith.constant dense<0.000000e+00> : vector<16x128xf32>
    %18 = tpu.matmul %16, %17, %cst_14 {dimension_numbers = #tpu.dot_dimension_numbers<[1], [0], [0], [1], [0, 0, 1, 1], [], []>} : vector<16x128xbf16>, vector<128x128xbf16>, vector<16x128xf32> -> vector<16x128xf32>
    %c0_15 = arith.constant 0 : index
    %c0_16 = arith.constant 0 : index
    %19 = vector.load %arg7[%c0_15, %c0_16] : memref<1x128xf32, #tpu.memory_space<vmem>>, vector<1x128xf32>
    %20 = vector.broadcast %19 : vector<1x128xf32> to vector<16x128xf32>
    %21 = arith.addf %18, %20 : vector<16x128xf32>
    %22 = math.tanh %21 : vector<16x128xf32>
    %c0_17 = arith.constant 0 : index
    %c0_18 = arith.constant 0 : index
    %23 = vector.load %arg8[%c0_17, %c0_18] : memref<16x128xf32, #tpu.memory_space<vmem>>, vector<16x128xf32>
    tpu.vector_store %arg8[%c0_17, %c0_18], %22 {strides = array<i32>} : memref<16x128xf32, #tpu.memory_space<vmem>>, vector<16x128xf32>,
    return
  }
  func.func @transform_0(%arg0: i32) -> (i32, i32) {
    %c0_i32 = arith.constant 0 : i32
    %c0_i32_0 = arith.constant 0 : i32
    return %arg0, %c0_i32 : i32, i32
  }
  func.func @transform_1(%arg0: i32) -> (i32, i32) {
    %c0_i32 = arith.constant 0 : i32
    %c0_i32_0 = arith.constant 0 : i32
    %c0_i32_1 = arith.constant 0 : i32
    return %c0_i32, %c0_i32_0 : i32, i32
  }
  func.func @transform_2(%arg0: i32) -> (i32, i32) {
    %c0_i32 = arith.constant 0 : i32
    %c0_i32_0 = arith.constant 0 : i32
    %c0_i32_1 = arith.constant 0 : i32
    return %c0_i32, %c0_i32_0 : i32, i32
  }
  func.func @transform_3(%arg0: i32) -> (i32, i32) {
    %c0_i32 = arith.constant 0 : i32
    %c0_i32_0 = arith.constant 0 : i32
    %c0_i32_1 = arith.constant 0 : i32
    return %c0_i32, %c0_i32_0 : i32, i32
  }
  func.func @transform_4(%arg0: i32) -> (i32, i32) {
    %c0_i32 = arith.constant 0 : i32
    %c0_i32_0 = arith.constant 0 : i32
    %c0_i32_1 = arith.constant 0 : i32
    return %c0_i32, %c0_i32_0 : i32, i32
  }
  func.func @transform_5(%arg0: i32) -> (i32, i32) {
    %c0_i32 = arith.constant 0 : i32
    %c0_i32_0 = arith.constant 0 : i32
    %c0_i32_1 = arith.constant 0 : i32
    return %c0_i32, %c0_i32_0 : i32, i32
  }
  func.func @transform_6(%arg0: i32) -> (i32, i32) {
    %c0_i32 = arith.constant 0 : i32
    %c0_i32_0 = arith.constant 0 : i32
    %c0_i32_1 = arith.constant 0 : i32
    return %c0_i32, %c0_i32_0 : i32, i32
  }
  func.func @transform_7(%arg0: i32) -> (i32, i32) {
    %c0_i32 = arith.constant 0 : i32
    %c0_i32_0 = arith.constant 0 : i32
    return %arg0, %c0_i32 : i32, i32
  }
}

</mosaic_0001>

<bundles_post_ra>
// kernel: tpu_custom_call.1
= control target key start
LH: loop header
LB: loop body
LE: loop exit
PB: predicated region body
PF: predicated region fallthrough
CT: control target
= control target key end

     0   :  { %12 = vsyncpa [#allocation3], 0  ;;  %s756_s0 = inlined_call_operand.hbm [shape: bf16[16,32], index: 0, kind: input, shape index: {}]   ;;  %s757_s1 = inlined_call_operand.hbm [shape: bf16[32,128], index: 1, kind: input, shape index: {}]   ;;  %s758_s2 = inlined_call_operand.vmem [shape: f32[1,128], index: 2, kind: input, shape index: {}]   ;;  %s759_s3 = inlined_call_operand.hbm [shape: bf16[128,128], index: 3, kind: input, shape index: {}]   ;;  %s760_s4 = inlined_call_operand.vmem [shape: f32[1,128], index: 4, kind: input, shape index: {}]   ;;  %s761_s5 = inlined_call_operand.hbm [shape: bf16[128,128], index: 5, kind: input, shape index: {}]   ;;  %s762_s6 = inlined_call_operand.vmem [shape: f32[1,128], index: 6, kind: input, shape index: {}]   ;;  %s763_s7 = inlined_call_operand.hbm [shape: f32[16,128], index: 7, kind: output, shape index: {}]  }
   0x1   :  { %13 = vsyncpa [#allocation6], 0 }
   0x2   :  { %14 = vsyncpa [#allocation9], 0 }
   0x3   :  { %15 = vsyncpa [#allocation4], 0  ;;  %s645_s24 = smov [#allocation5]   ;;  %s646_s26 = smov [#allocation2]  }
   0x4   :  { %s33_s25 = sshll.u32 %s645_s24, 4  ;;  %s21_s27 = sshll.u32 %s646_s26, 4  ;;  %s34_s25 = int_to_ptr.vmem [resolvable:$true] %s33_s25  ;;  %s22_s27 = int_to_ptr.vmem [resolvable:$true] %s21_s27 }
   0x5   :  { %s545_s28 = scalar_lea.vmem %s34_s25, 256  ;;  %p550_p1 = scmp.lt.s32.totalorder %s34_s25, %s34_s25 }
   0x6   :  { %p546_p0 = scmp.ne.s32.totalorder %s34_s25, %s545_s28  ;;  %p551_p2 = scmp.lt.s32.totalorder %s545_s28, %s545_s28 }
   0x8   :  { %p552_p3 = por %p551_p2, %p550_p1 }
   0xa   :  { %p553_p4 = pnand %p552_p3, %p546_p0 }
   0xc   :  { %556 = shalt.err (!%p553_p4)
}
   0xd   :  { %s647_s29 = smov 64   ;;  %s648_s30 = smov 4  }
   0xe   :  { %39 = dma.hbm_to_vmem [thread:$0]  %s757_s1, 256, %s34_s25, [#allocation6], %s647_s29, %s647_s29, %s648_s30  }
   0xf   :  { %s565_s10 = scalar_lea.vmem %s22_s27, 128  ;;  %p570_p6 = scmp.lt.s32.totalorder %s22_s27, %s22_s27 }
  0x10   :  { %p566_p5 = scmp.ne.s32.totalorder %s22_s27, %s565_s10  ;;  %p571_p7 = scmp.lt.s32.totalorder %s565_s10, %s565_s10 }
  0x12   :  { %p572_p8 = por %p571_p7, %p570_p6 }
  0x14   :  { %p573_p9 = pnand %p572_p8, %p566_p5 }
  0x16   :  { %576 = shalt.err (!%p573_p9)
}
  0x17   :  { %27 = dma.hbm_to_vmem [thread:$0]  %s756_s0, 128, %s22_s27, [#allocation3], %s647_s29, %s647_s29, %s648_s30  }
  0x18   :  { %s649_s13 = smov [#allocation7]   ;;  %s650_s15 = smov [#allocation8]  }
  0x19   :  { %s47_s14 = sshll.u32 %s649_s13, 4  ;;  %s61_s16 = sshll.u32 %s650_s15, 4  ;;  %s48_s14 = int_to_ptr.vmem [resolvable:$true] %s47_s14  ;;  %s62_s16 = int_to_ptr.vmem [resolvable:$true] %s61_s16 }
  0x1a   :  { %s585_s1 = scalar_lea.vmem %s48_s14, 1024  ;;  %p590_p11 = scmp.lt.s32.totalorder %s48_s14, %s48_s14 }
  0x1b   :  { %p586_p10 = scmp.ne.s32.totalorder %s48_s14, %s585_s1  ;;  %p591_p12 = scmp.lt.s32.totalorder %s585_s1, %s585_s1 }
  0x1d   :  { %p592_p13 = por %p591_p12, %p590_p11 }
  0x1f   :  { %p593_p0 = pnand %p592_p13, %p586_p10 }
  0x21   :  { %596 = shalt.err (!%p593_p0)
}
  0x22   :  { %53 = dma.hbm_to_vmem [thread:$0]  %s759_s3, 1024, %s48_s14, [#allocation6], %s647_s29, %s647_s29, %s648_s30  }
  0x23   :  { %s605_s0 = scalar_lea.vmem %s62_s16, 1024  ;;  %p610_p2 = scmp.lt.s32.totalorder %s62_s16, %s62_s16 }
  0x24   :  { %p606_p1 = scmp.ne.s32.totalorder %s62_s16, %s605_s0  ;;  %p611_p3 = scmp.lt.s32.totalorder %s605_s0, %s605_s0 }
  0x26   :  { %p612_p4 = por %p611_p3, %p610_p2 }
  0x28   :  { %p613_p5 = pnand %p612_p4, %p606_p1 }
  0x2a   :  { %616 = shalt.err (!%p613_p5)
}
  0x2b   :  { %67 = dma.hbm_to_vmem [thread:$0]  %s761_s5, 1024, %s62_s16, [#allocation9], %s647_s29, %s647_s29, %s648_s30  }
  0x2c   :  { %637 = dma.done.wait [#allocation3], 128  }
  0x2d   :  { %638 = vsyncadd [#allocation3], 4294967168 }
  0x2e   :  { %639 = dma.done.wait [#allocation6], 1280  }
  0x2f   :  { %640 = vsyncadd [#allocation6], 4294966016 }
  0x30   :  { %641 = dma.done.wait [#allocation9], 1024  }
  0x31   :  { %642 = vsyncadd [#allocation9], 4294966272  ;;  %v651_v0 = vmov 0.0   ;;  %vm652_vm0 = vmmov 0   ;;  %v514_v1 = vld [vmem:[#allocation5 + $0x8] sm:$0xff]   ;;  %v515_v2 = vld [vmem:[#allocation5] sm:$0xff]  }
  0x32   :  { %455 = vmatprep.subr.bf16.mxu0 %v651_v0  ;;  %459 = vmatprep.mubr.msk.bf16.mxu0 %vm652_vm0, %v651_v0  ;;  %v517_v3 = vld [vmem:[#allocation7 + $0x38] sm:$0xff]   ;;  %v516_v4 = vld [vmem:[#allocation2] sm:$0xff]   ;;  %v518_v5 = vld [vmem:[#allocation7 + $0x30] sm:$0xff]   ;;  %vm113_vm1 = vcmask 261120  }
  0x33   :  { %463 = vmatprep.subr.bf16.mxu1 %v651_v0  ;;  %479 = vmatprep.mubr.msk.bf16.mxu1 %vm652_vm0, %v651_v0  ;;  %v519_v6 = vld [vmem:[#allocation7 + $0x28] sm:$0xff]   ;;  %v520_v7 = vld [vmem:[#allocation7 + $0x20] sm:$0xff]   ;;  %v521_v8 = vld [vmem:[#allocation7 + $0x18] sm:$0xff]  }
  0x34   :  { %456 = vmatpush3.bf16.msra.mxu0 %v514_v1  ;;  %464 = vmatpush3.bf16.msra.mxu1 %v517_v3  ;;  %v522_v9 = vld [vmem:[#allocation7 + $0x10] sm:$0xff]   ;;  %v523_v10 = vld [vmem:[#allocation7 + $0x8] sm:$0xff]   ;;  %v524_v11 = vld [vmem:[#allocation7] sm:$0xff]  }
  0x35   :  { %457 = vmatprep.subr.bf16.mxu0 %v651_v0  ;;  %465 = vmatprep.subr.bf16.mxu1 %v651_v0  ;;  %v525_v12 = vld [vmem:[#allocation8 + $0x38] sm:$0xff]   ;;  %v526_v13 = vld [vmem:[#allocation8 + $0x30] sm:$0xff]   ;;  %v527_v14 = vld [vmem:[#allocation8 + $0x28] sm:$0xff]  }
  0x36   :  { %v528_v15 = vld [vmem:[#allocation8 + $0x20] sm:$0xff]   ;;  %v529_v16 = vld [vmem:[#allocation8 + $0x18] sm:$0xff]   ;;  %v411_v17 = vld [vmem:[%s758_s2] ss:$0 sm:$0xff] }
  0x37   :  { %v530_v27 = vld [vmem:[#allocation8 + $0x10] sm:$0xff]   ;;  %v531_v28 = vld [vmem:[#allocation8 + $0x8] sm:$0xff]   ;;  %v532_v29 = vld [vmem:[#allocation8] sm:$0xff]  }
  0x38   :  { %458 = vmatpush3.bf16.msra.mxu0 %v515_v2  ;;  %466 = vmatpush3.bf16.msra.mxu1 %v518_v5  ;;  %v416_v30 = vld [vmem:[%s760_s4] ss:$0 sm:$0xff]  ;;  %s653_s4 = smov [#allocation10]  }
  0x39   :  { %483 = vmatprep.subr.bf16.mxu0 %v651_v0  ;;  %467 = vmatprep.subr.bf16.mxu1 %v651_v0  ;;  %v425_v40 = vld [vmem:[%s762_s6] ss:$0 sm:$0xff]  ;;  %s397_s24 = sshll.u32 %s653_s4, 4  ;;  %s398_s24 = int_to_ptr.vmem [resolvable:$true] %s397_s24 }
  0x3a   :  { %s617_s25 = scalar_lea.vmem %s398_s24, 256  ;;  %p622_p7 = scmp.lt.s32.totalorder %s398_s24, %s398_s24 }
  0x3b   :  { %460 = vmatmul.mubr.msk.bf16.vlgmr.msra.gmra.mxu0 %vm113_vm1, %v516_v4  ;;  %p618_p6 = scmp.ne.s32.totalorder %s398_s24, %s617_s25  ;;  %p623_p8 = scmp.lt.s32.totalorder %s617_s25, %s617_s25 }
  0x3c   :  { %499 = vmatprep.mubr.msk.bf16.mxu0 %vm652_vm0, %v651_v0  ;;  %468 = vmatpush3.bf16.msra.mxu1 %v519_v6 }
  0x3d   :  { %469 = vmatprep.subr.bf16.mxu1 %v651_v0  ;;  %484 = vmatpush3.bf16.msra.mxu0 %v525_v12  ;;  %p624_p9 = por %p623_p8, %p622_p7 }
  0x3e   :  { %485 = vmatprep.subr.bf16.mxu0 %v651_v0 }
  0x3f   :  { %p625_p10 = pnand %p624_p9, %p618_p6 }
  0x40   :  { %470 = vmatpush3.bf16.msra.mxu1 %v520_v7 }
  0x41   :  { %471 = vmatprep.subr.bf16.mxu1 %v651_v0  ;;  %486 = vmatpush3.bf16.msra.mxu0 %v526_v13 }
  0x42   :  { %487 = vmatprep.subr.bf16.mxu0 %v651_v0 }
  0x44   :  { %472 = vmatpush3.bf16.msra.mxu1 %v521_v8 }
  0x45   :  { %473 = vmatprep.subr.bf16.mxu1 %v651_v0  ;;  %488 = vmatpush3.bf16.msra.mxu0 %v527_v14 }
  0x46   :  { %489 = vmatprep.subr.bf16.mxu0 %v651_v0 }
  0x48   :  { %474 = vmatpush3.bf16.msra.mxu1 %v522_v9 }
  0x49   :  { %475 = vmatprep.subr.bf16.mxu1 %v651_v0  ;;  %490 = vmatpush3.bf16.msra.mxu0 %v528_v15 }
  0x4a   :  { %491 = vmatprep.subr.bf16.mxu0 %v651_v0 }
  0x4c   :  { %476 = vmatpush3.bf16.msra.mxu1 %v523_v10 }
  0x4d   :  { %477 = vmatprep.subr.bf16.mxu1 %v651_v0  ;;  %492 = vmatpush3.bf16.msra.mxu0 %v529_v16 }
  0x4e   :  { %493 = vmatprep.subr.bf16.mxu0 %v651_v0 }
  0x50   :  { %478 = vmatpush3.bf16.msra.mxu1 %v524_v11 }
  0x51   :  { %494 = vmatpush3.bf16.msra.mxu0 %v530_v27 }
  0x52   :  { %495 = vmatprep.subr.bf16.mxu0 %v651_v0 }
  0x55   :  { %496 = vmatpush3.bf16.msra.mxu0 %v531_v28 }
  0x56   :  { %497 = vmatprep.subr.bf16.mxu0 %v651_v0 }
  0x59   :  { %498 = vmatpush3.bf16.msra.mxu0 %v532_v29 }
  0xfb   :  { %v151_v18 = vpop.f32.mrf.mxu0 }
  0xfc   :  { %v152_v20 = vadd.f32 %v411_v17, %v151_v18 }
  0xfd   :  { %v461_v19 = vpop.f32.mrf.mxu0 }
  0xfe   :  { %v158_v24 = vmax.f32 %v152_v20, 0.0 }
  0xff   :  { %v154_v21 = vpop.f32.mrf.mxu0 }
 0x100   :  { %v155_v22 = vadd.f32 %v411_v17, %v154_v21 }
 0x101   :  { %v462_v23 = vpop.f32.mrf.mxu0 }
 0x102   :  { %v159_v25 = vmax.f32 %v155_v22, 0.0 }
 0x104   :  { %v160_v26 = vpack.c.bf16 %v159_v25, %v158_v24 }
 0x106   :  { %480 = vmatmul.mubr.bf16.vlgmr.msra.gmra.mxu1 %v160_v26 }
 0x1c6   :  { %v266_v31 = vpop.f32.mrf.mxu1 }
 0x1c7   :  { %v267_v33 = vadd.f32 %v416_v30, %v266_v31 }
 0x1c8   :  { %v481_v32 = vpop.f32.mrf.mxu1 }
 0x1c9   :  { %v273_v37 = vmax.f32 %v267_v33, 0.0 }
 0x1ca   :  { %v269_v34 = vpop.f32.mrf.mxu1 }
 0x1cb   :  { %v270_v35 = vadd.f32 %v416_v30, %v269_v34 }
 0x1cc   :  { %v482_v36 = vpop.f32.mrf.mxu1 }
 0x1cd   :  { %v274_v38 = vmax.f32 %v270_v35, 0.0 }
 0x1cf   :  { %v275_v39 = vpack.c.bf16 %v274_v38, %v273_v37 }
 0x1d1   :  { %500 = vmatmul.mubr.bf16.vlgmr.msra.gmra.mxu0 %v275_v39 }
 0x291   :  { %v381_v41 = vpop.f32.mrf.mxu0 }
 0x292   :  { %v382_v42 = vadd.f32 %v425_v40, %v381_v41 }
 0x293   :  { %v501_v43 = vpop.f32.mrf.mxu0 }
 0x294   :  { %533 = vtanh.f32 %v382_v42 }
 0x295   :  { %v384_v44 = vpop.f32.mrf.mxu0 }
 0x296   :  { %v385_v45 = vadd.f32 %v425_v40, %v384_v44 }
 0x297   :  { %v502_v46 = vpop.f32.mrf.mxu0 }
 0x298   :  { %535 = vtanh.f32 %v385_v45 }
 0x2a1   :  { %v534_v47 = vpop.eup %533 }
 0x2a2   :  { %390 = vst [vmem:[#allocation10] sm:$0xff] %v534_v47 }
 0x2a5   :  { %v536_v48 = vpop.eup %535 }
 0x2a6   :  { %391 = vst [vmem:[#allocation10 + $0x8] sm:$0xff] %v536_v48 }
 0x2a7   :  { %628 = shalt.err (!%p625_p10)
}
 0x2a8   :  { %s654_s6 = smov 128   ;;  %s655_s26 = smov 8  }
 0x2a9   :  { %403 = dma.vmem_to_hbm [thread:$0]  %s398_s24, 256, %s763_s7, [#allocation4], %s654_s6, %s654_s6, %s655_s26  }
 0x2aa   :  { %643 = dma.done.wait [#allocation4], 256  }
 0x2ab   :  { %644 = vsyncadd [#allocation4], 4294967040 }
 0x2ac   :  { %407 = vsyncpa [#allocation3], 1 }
 0x2ad   :  { %408 = vsyncpa [#allocation6], 1 }
 0x2ae   :  { %409 = vsyncpa [#allocation9], 1 }
 0x2af   :  { %410 = vsyncpa [#allocation4], 1 }

</bundles_post_ra>
